<compile_context>
chip_gen: v7x
topology: tpu7x:2x2x1
jax: 0.10.0
libtpu: 0.0.40
codegen_flags: <defaults>
</compile_context>

<pallas_src>
import jax
import jax.numpy as jnp
from jax.experimental import pallas as pl
from jax.experimental.pallas import tpu as pltpu

_LANE_CHOICES = (2048, 1024, 512, 256, 128)   # lane-dense last-dim candidates


def _identity_kernel(s_ref, x_ref, o_ref):
    # s_ref: SMEM (1,) f32 scalar (the "dummy" parameter, via scalar prefetch)
    # x_ref / o_ref: VMEM (tm, C) tiles
    s = s_ref[0].astype(x_ref.dtype)          # single scalar cast, hoisted
    o_ref[...] = x_ref[...] * s


def _round_up(a, b):
    return ((a + b - 1) // b) * b


def _vmem_capacity_bytes():
    try:
        return int(pltpu.get_tpu_info().vmem_capacity_bytes)
    except Exception:
        return 64 * 1024 * 1024               # conservative default (v7x per-TC)


def identity_forward(x, dummy, *, donate_x=False):
    """Mirrors Identity.forward: out = dummy * x (dummy is a (1,) parameter)."""
    orig_shape = x.shape
    orig_dtype = x.dtype
    n = x.size
    if n == 0:
        return x

    itemsize = jnp.dtype(orig_dtype).itemsize
    sub = max(8, 32 // itemsize)              # sublane tile: 8 f32 / 16 bf16 / 32 int8

    # ---- lane-dense 2-D view ---------------------------------------------
    flat = x.reshape(-1)
    needs_slice = False
    if n % 128 == 0:
        # fast path: no padding, no post-slice
        c = next(cc for cc in _LANE_CHOICES if n % cc == 0)
        n_view = n
    else:
        # ragged tail: minimal pad to the next multiple of 128 only
        n_view = _round_up(n, 128)
        flat = jnp.pad(flat, (0, n_view - n))
        c = 128
        needs_slice = True
    rows = n_view // c
    x2d = flat.reshape(rows, c)

    # ---- tile sizing (generation-aware, real itemsize) ---------------------
    vmem_cap = _vmem_capacity_bytes()
    tile_budget = vmem_cap // 16              # ~4 MiB/buffer @64 MiB VMEM, ~8 MiB @128 MiB
    tm_target = max(sub, (tile_budget // (c * itemsize)) // sub * sub)

    if rows <= sub:
        tm = rows                             # single full-dim block (tiny inputs)
    else:
        tm = min(tm_target, (rows // sub) * sub)
        if pl.cdiv(rows, tm) < 2:             # keep >=2 grid steps for v7x megacore
            tm = max(sub, _round_up(pl.cdiv(rows, 2), sub))
    grid = (pl.cdiv(rows, tm),)

    tile_bytes = tm * c * itemsize
    vmem_limit = int(min(vmem_cap // 2, max(5 * tile_bytes, 16 * 1024 * 1024)))

    scale = jnp.asarray(dummy, dtype=jnp.float32).reshape(-1)[:1]

    extra_kwargs = {}
    if donate_x and not needs_slice:
        # operand 0 is the scalar-prefetch arg, operand 1 is x2d
        extra_kwargs["input_output_aliases"] = {1: 0}

    out2d = pl.pallas_call(
        _identity_kernel,
        out_shape=jax.ShapeDtypeStruct((rows, c), orig_dtype),
        grid_spec=pltpu.PrefetchScalarGridSpec(
            num_scalar_prefetch=1,            # scale -> SMEM
            grid=grid,
            in_specs=[pl.BlockSpec((tm, c), lambda i, s_ref: (i, 0))],
            out_specs=pl.BlockSpec((tm, c), lambda i, s_ref: (i, 0)),
        ),
        compiler_params=pltpu.CompilerParams(
            dimension_semantics=("parallel",),
            vmem_limit_bytes=vmem_limit,
        ),
        cost_estimate=pl.CostEstimate(
            flops=n,
            transcendentals=0,
            bytes_accessed=2 * n * itemsize,
        ),
        **extra_kwargs,
    )(scale, x2d)

    if needs_slice:
        return out2d.reshape(-1)[:n].reshape(orig_shape)
    return out2d.reshape(orig_shape)


if __name__ == "__main__":
    key = jax.random.PRNGKey(0)
    x = jax.random.normal(key, (2, 4, 16, 16), dtype=jnp.float32)

    # nn.Parameter(torch.ones(1), requires_grad=False)
    dummy = jnp.ones((1,), dtype=jnp.float32)

    out = identity_forward(x, dummy)
    out = jax.block_until_ready(out)

    # Reference: plain JAX mirror of the PyTorch forward.
    ref = dummy * x
    assert out.shape == x.shape
    assert out.dtype == x.dtype
    assert jnp.allclose(out, ref, atol=1e-6, rtol=1e-6)

    print("KERNEL_OK")
</pallas_src>

<mosaic_0001>
module attributes {stable_mosaic.version = 11 : i64} {
  func.func @_identity_kernel(%arg0: i32, %arg1: memref<1xf32, #tpu.memory_space<smem>>, %arg2: memref<1x2048xf32, #tpu.memory_space<vmem>>, %arg3: memref<1x2048xf32, #tpu.memory_space<vmem>>) attributes {dimension_semantics = [#tpu.dimension_semantics<parallel>], iteration_bounds = array<i64: 1>, scalar_prefetch = 1 : i64, scratch_operands = 0 : i64, tpu.core_type = #tpu.core_type<tc>, window_params = [{transform_indices = @transform_0, window_bounds = array<i64: 1, 2048>}, {transform_indices = @transform_1, window_bounds = array<i64: 1, 2048>}]} {
    %c0 = arith.constant 0 : index
    %0 = memref.load %arg1[%c0] : memref<1xf32, #tpu.memory_space<smem>>
    %c0_0 = arith.constant 0 : index
    %c0_1 = arith.constant 0 : index
    %1 = vector.load %arg2[%c0_0, %c0_1] : memref<1x2048xf32, #tpu.memory_space<vmem>>, vector<1x2048xf32>
    %2 = vector.broadcast %0 : f32 to vector<1x2048xf32>
    %3 = arith.mulf %1, %2 : vector<1x2048xf32>
    %c0_2 = arith.constant 0 : index
    %c0_3 = arith.constant 0 : index
    %4 = vector.load %arg3[%c0_2, %c0_3] : memref<1x2048xf32, #tpu.memory_space<vmem>>, vector<1x2048xf32>
    tpu.vector_store %arg3[%c0_2, %c0_3], %3 {strides = array<i32>} : memref<1x2048xf32, #tpu.memory_space<vmem>>, vector<1x2048xf32>,
    return
  }
  func.func @transform_0(%arg0: i32, %arg1: memref<1xf32, #tpu.memory_space<smem>>) -> (i32, i32) {
    %c0_i32 = arith.constant 0 : i32
    %c0_i32_0 = arith.constant 0 : i32
    return %arg0, %c0_i32 : i32, i32
  }
  func.func @transform_1(%arg0: i32, %arg1: memref<1xf32, #tpu.memory_space<smem>>) -> (i32, i32) {
    %c0_i32 = arith.constant 0 : i32
    %c0_i32_0 = arith.constant 0 : i32
    return %arg0, %c0_i32 : i32, i32
  }
}

</mosaic_0001>

<bundles_post_ra>
// kernel: tpu_custom_call.1
= control target key start
LH: loop header
LB: loop body
LE: loop exit
PB: predicated region body
PF: predicated region fallthrough
CT: control target
= control target key end

     0   :  { %8 = vsyncpa [#allocation5], 0  ;;  %s140_s0 = inlined_call_operand.<no memory space> [shape: f32[1], index: 0, kind: input, shape index: {}]   ;;  %s141_s1 = inlined_call_operand.hbm [shape: f32[1,2048], index: 1, kind: input, shape index: {}]   ;;  %s142_s2 = inlined_call_operand.hbm [shape: f32[1,2048], index: 2, kind: output, shape index: {}]  }
   0x1   :  { %9 = vsyncpa [#allocation6], 0  ;;  %s96_s9 = smov [#allocation4]   ;;  %s48_s13 = scalar_lea.hbm %s141_s1, 256 }
   0x2   :  { %s16_s10 = sshll.u32 %s96_s9, 4  ;;  %p49_p0 = scmp.ne.s32.totalorder %s141_s1, %s48_s13  ;;  %s17_s10 = int_to_ptr.vmem [resolvable:$true] %s16_s10 }
   0x3   :  { %p52_p1 = scmp.lt.u32.totalorder %s48_s13, %s141_s1 }
   0x5   :  { %p54_p2 = pnand %p52_p1, %p49_p0 }
   0x7   :  { %57 = shalt.err (!%p54_p2)
}
   0x8   :  { %s58_s18 = scalar_lea.vmem %s17_s10, 256  ;;  %p63_p4 = scmp.lt.s32.totalorder %s17_s10, %s17_s10 }
   0x9   :  { %p59_p3 = scmp.ne.s32.totalorder %s17_s10, %s58_s18  ;;  %p64_p5 = scmp.lt.s32.totalorder %s58_s18, %s58_s18 }
   0xb   :  { %p65_p6 = por %p64_p5, %p63_p4 }
   0xd   :  { %p66_p7 = pnand %p65_p6, %p59_p3 }
   0xf   :  { %69 = shalt.err (!%p66_p7)
}
  0x10   :  { %19 = dma.hbm_to_vmem [thread:$0]  %s141_s1, 256, %s17_s10, [#allocation5]  }
  0x11   :  { %92 = dma.done.wait [#allocation5], 256  }
  0x12   :  { %93 = vsyncadd [#allocation5], 4294967040  ;;  %v26_v0 = vstv %s140_s0  ;;  %s97_s23 = smov [#allocation7]   ;;  %v24_v1 = vld [vmem:[#allocation4] sm:$0xff]  ;;  %v25_v2 = vld [vmem:[#allocation4 + $0x8] sm:$0xff] }
  0x13   :  { %s37_s24 = sshll.u32 %s97_s23, 4  ;;  %v27_v3 = vmul.f32 %v26_v0, %v24_v1  ;;  %v28_v4 = vmul.f32 %v26_v0, %v25_v2  ;;  %s38_s24 = int_to_ptr.vmem [resolvable:$true] %s37_s24 }
  0x14   :  { %s70_s25 = scalar_lea.vmem %s38_s24, 256  ;;  %p75_p9 = scmp.lt.s32.totalorder %s38_s24, %s38_s24 }
  0x15   :  { %29 = vst [vmem:[#allocation7] sm:$0xff] %v27_v3  ;;  %30 = vst [vmem:[#allocation7 + $0x8] sm:$0xff] %v28_v4  ;;  %p71_p8 = scmp.ne.s32.totalorder %s38_s24, %s70_s25  ;;  %p76_p10 = scmp.lt.s32.totalorder %s70_s25, %s70_s25 }
  0x17   :  { %p77_p11 = por %p76_p10, %p75_p9 }
  0x19   :  { %p78_p12 = pnand %p77_p11, %p71_p8 }
  0x1b   :  { %81 = shalt.err (!%p78_p12)
}
  0x1c   :  { %s82_s0 = scalar_lea.hbm %s142_s2, 256 }
  0x1d   :  { %p83_p13 = scmp.ne.s32.totalorder %s142_s2, %s82_s0  ;;  %p86_p0 = scmp.lt.u32.totalorder %s82_s0, %s142_s2 }
  0x1f   :  { %p88_p1 = pnand %p86_p0, %p83_p13 }
  0x21   :  { %91 = shalt.err (!%p88_p1)
}
  0x22   :  { %40 = dma.vmem_to_hbm [thread:$0]  %s38_s24, 256, %s142_s2, [#allocation6]  }
  0x23   :  { %94 = dma.done.wait [#allocation6], 256  }
  0x24   :  { %95 = vsyncadd [#allocation6], 4294967040 }
  0x25   :  { %44 = vsyncpa [#allocation5], 1 }
  0x26   :  { %45 = vsyncpa [#allocation6], 1 }

</bundles_post_ra>
